<compile_context>
chip_gen: v7x
topology: tpu7x:2x2x1
jax: 0.10.0
libtpu: 0.0.40
codegen_flags: <defaults>
</compile_context>

<pallas_src>
import functools

import jax
import jax.numpy as jnp
from jax.experimental import pallas as pl
from jax.experimental.pallas import tpu as pltpu

# Logical (PyTorch) dimensions.
D_IN = 25 * 18     # 450
H1 = 90
H2 = 512
H3 = 512
D_OUT = 5          # `saida`


def _round_up(n, m):
    return ((n + m - 1) // m) * m


# Lane-padded output dims of each layer (multiples of 128); padding
# rows/cols carry zero weights/biases so the padded math is exact.
H1_P = _round_up(H1, 128)      # 128
H2_P = _round_up(H2, 128)      # 512
H3_P = _round_up(H3, 128)      # 512
D_OUT_P = _round_up(D_OUT, 128)  # 128


def _mlp_kernel(x_ref, w1_ref, b1_ref, w2_ref, b2_ref,
                w3_ref, b3_ref, w4_ref, b4_ref, o_ref):
    # fc1 + ReLU   (dropout = identity in eval mode).
    # x arrives as f32 and is cast to bf16 in-kernel (avoids a wrapper pass).
    x = x_ref[...].astype(jnp.bfloat16)
    h = jnp.dot(x, w1_ref[...], preferred_element_type=jnp.float32)
    h = jnp.maximum(h + b1_ref[...], 0.0)
    # fc2 + ReLU
    h = jnp.dot(h.astype(jnp.bfloat16), w2_ref[...],
                preferred_element_type=jnp.float32)
    h = jnp.maximum(h + b2_ref[...], 0.0)
    # fc3 + ReLU
    h = jnp.dot(h.astype(jnp.bfloat16), w3_ref[...],
                preferred_element_type=jnp.float32)
    h = jnp.maximum(h + b3_ref[...], 0.0)
    # fc4 (no activation); write only the 5 real logit lanes.
    o = jnp.dot(h.astype(jnp.bfloat16), w4_ref[...],
                preferred_element_type=jnp.float32)
    o_ref[...] = (o + b4_ref[...])[:, :D_OUT]


def _resident(shape):
    """Full-array block that stays VMEM-resident across the batch grid."""
    return pl.BlockSpec(shape, lambda i: (0, 0))


@functools.partial(jax.jit, static_argnames=("tile_b",))
def modelo_bot_forward(x, params, tile_b=1024):
    """x: (25,18) / (450,) / (B,450) / (B,25,18). Returns (B, 5) f32 logits
    (B=1 for a single sample, matching `x.view(1, 25*18)`).

    tile_b: max batch rows per grid step.  1024 is a good default on v6e/v7x;
    use 256-512 on v5e.
    """
    (w1, b1), (w2, b2), (w3, b3), (w4, b4) = params

    # Flatten to (B, 450), exactly like `x.view(1, 25*18)` for one sample.
    if x.ndim == 3:                               # (B, 25, 18)
        x_2d = jnp.reshape(x, (x.shape[0], D_IN))
    elif x.ndim == 2 and x.shape[1] == D_IN:      # (B, 450)
        x_2d = x
    else:                                         # single sample (25,18)/(450,)
        x_2d = jnp.reshape(x, (1, D_IN))
    x_2d = x_2d.astype(jnp.float32)
    batch = x_2d.shape[0]

    # Batch tile: small batch -> one tile (latency path); medium -> exactly
    # 2 tiles so both v7x TensorCores get work; large -> tile_b rows/step.
    if batch <= 128:
        tb = max(16, _round_up(batch, 16))
    elif batch <= 2 * tile_b:
        tb = _round_up((batch + 1) // 2, 16)
    else:
        tb = _round_up(tile_b, 16)
    b_pad = _round_up(batch, tb)
    grid = (b_pad // tb,)

    # Only a batch-row pad (no feature pad, no dtype cast); no-op when batch
    # already divides the tile.
    if b_pad != batch:
        x_2d = jnp.pad(x_2d, ((0, b_pad - batch), (0, 0)))

    flops = 2 * b_pad * (D_IN * H1_P + H1_P * H2_P + H2_P * H3_P
                         + H3_P * D_OUT_P)
    weight_bytes = 2 * (D_IN * H1_P + H1_P * H2_P + H2_P * H3_P
                        + H3_P * D_OUT_P)                      # bf16 weights
    bias_bytes = 4 * (H1_P + H2_P + H3_P + D_OUT_P)            # f32 biases
    io_bytes = 4 * b_pad * (D_IN + D_OUT)                      # f32 in/out
    cost = pl.CostEstimate(flops=flops, transcendentals=0,
                           bytes_accessed=weight_bytes + bias_bytes + io_bytes)

    out_pad = pl.pallas_call(
        _mlp_kernel,
        out_shape=jax.ShapeDtypeStruct((b_pad, D_OUT), jnp.float32),
        grid=grid,
        in_specs=[
            # x tile: full 450-column last dim (legal: equals full array dim).
            pl.BlockSpec((tb, D_IN), lambda i: (i, 0)),
            _resident((D_IN, H1_P)), _resident((1, H1_P)),
            _resident((H1_P, H2_P)), _resident((1, H2_P)),
            _resident((H2_P, H3_P)), _resident((1, H3_P)),
            _resident((H3_P, D_OUT_P)), _resident((1, D_OUT_P)),
        ],
        # Output: only the 5 real logits (full-last-dim block), f32.
        out_specs=pl.BlockSpec((tb, D_OUT), lambda i: (i, 0)),
        compiler_params=pltpu.CompilerParams(
            dimension_semantics=("parallel",),
            vmem_limit_bytes=32 * 1024 * 1024),
        cost_estimate=cost,
    )(x_2d, w1, b1, w2, b2, w3, b3, w4, b4)

    return out_pad[:batch]


def init_params(key):
    """Deterministic PyTorch-style (uniform +/- 1/sqrt(fan_in)) init.
    Weights stored [in, out] bf16, biases f32 (1, out).  Only output dims are
    zero-padded to lane width (90->128, 5->128); w1 keeps its true K=450."""
    dims = [(D_IN, H1, D_IN, H1_P),
            (H1, H2, H1_P, H2_P),
            (H2, H3, H2_P, H3_P),
            (H3, D_OUT, H3_P, D_OUT_P)]
    params = []
    for (fan_in, fan_out, in_p, out_p) in dims:
        key, kw, kb = jax.random.split(key, 3)
        bound = 1.0 / (fan_in ** 0.5)
        w = jax.random.uniform(kw, (fan_in, fan_out), jnp.float32,
                               minval=-bound, maxval=bound)
        b = jax.random.uniform(kb, (fan_out,), jnp.float32,
                               minval=-bound, maxval=bound)
        w_pad = jnp.zeros((in_p, out_p), jnp.float32).at[:fan_in, :fan_out].set(w)
        b_pad = jnp.zeros((1, out_p), jnp.float32).at[0, :fan_out].set(b)
        params.append((w_pad.astype(jnp.bfloat16), b_pad))
    return params


def reference_forward(x, params):
    """Pure-JAX reference (same bf16-weight / f32-accumulate math, no Pallas).
    Note: bf16 weights deviate from the f32 PyTorch module by ~1e-2 in logits."""
    (w1, b1), (w2, b2), (w3, b3), (w4, b4) = params
    if x.ndim == 3:
        x_2d = jnp.reshape(x, (x.shape[0], D_IN))
    elif x.ndim == 2 and x.shape[1] == D_IN:
        x_2d = x
    else:
        x_2d = jnp.reshape(x, (1, D_IN))
    x_2d = x_2d.astype(jnp.float32)

    def dot(a, w):
        return jnp.dot(a.astype(jnp.bfloat16), w,
                       preferred_element_type=jnp.float32)

    h = jnp.maximum(dot(x_2d, w1) + b1, 0.0)
    h = jnp.maximum(dot(h, w2) + b2, 0.0)
    h = jnp.maximum(dot(h, w3) + b3, 0.0)
    return (dot(h, w4) + b4)[:, :D_OUT]


if __name__ == "__main__":
    key = jax.random.PRNGKey(0)
    key, kx, kx2 = jax.random.split(key, 3)

    params = init_params(key)

    # Small batched input: 4 samples of the module's natural (25, 18) shape.
    B = 4
    x = jax.random.normal(kx, (B, 25, 18), dtype=jnp.float32)
    out = jax.block_until_ready(modelo_bot_forward(x, params))
    ref = reference_forward(x, params)
    assert out.shape == (B, D_OUT), out.shape
    assert jnp.allclose(out, ref, atol=2e-2, rtol=2e-2), (out, ref)

    # Batch > 128 exercises the multi-step grid (2 tiles, megacore-splittable).
    B2 = 160
    x2 = jax.random.normal(kx2, (B2, 25, 18), dtype=jnp.float32)
    out2 = jax.block_until_ready(modelo_bot_forward(x2, params))
    ref2 = reference_forward(x2, params)
    assert out2.shape == (B2, D_OUT), out2.shape
    assert jnp.allclose(out2, ref2, atol=2e-2, rtol=2e-2), (out2, ref2)

    # Single-sample path (original module semantics: x.view(1, 450)).
    out1 = jax.block_until_ready(modelo_bot_forward(x[0], params))
    ref1 = reference_forward(x[0], params)
    assert out1.shape == (1, D_OUT), out1.shape
    assert jnp.allclose(out1, ref1, atol=2e-2, rtol=2e-2), (out1, ref1)

    print("KERNEL_OK")
</pallas_src>

<mosaic_0001>
module attributes {stable_mosaic.version = 11 : i64} {
  func.func @_mlp_kernel(%arg0: i32, %arg1: memref<16x450xf32, #tpu.memory_space<vmem>>, %arg2: memref<450x128xbf16, #tpu.memory_space<vmem>>, %arg3: memref<1x128xf32, #tpu.memory_space<vmem>>, %arg4: memref<128x512xbf16, #tpu.memory_space<vmem>>, %arg5: memref<1x512xf32, #tpu.memory_space<vmem>>, %arg6: memref<512x512xbf16, #tpu.memory_space<vmem>>, %arg7: memref<1x512xf32, #tpu.memory_space<vmem>>, %arg8: memref<512x128xbf16, #tpu.memory_space<vmem>>, %arg9: memref<1x128xf32, #tpu.memory_space<vmem>>, %arg10: memref<16x5xf32, #tpu.memory_space<vmem>>) attributes {dimension_semantics = [#tpu.dimension_semantics<parallel>], iteration_bounds = array<i64: 1>, scalar_prefetch = 0 : i64, scratch_operands = 0 : i64, tpu.core_type = #tpu.core_type<tc>, window_params = [{transform_indices = @transform_0, window_bounds = array<i64: 16, 450>}, {pipeline_mode = #tpu.pipeline_mode<synchronous>, transform_indices = @transform_1, window_bounds = array<i64: 450, 128>}, {pipeline_mode = #tpu.pipeline_mode<synchronous>, transform_indices = @transform_2, window_bounds = array<i64: 1, 128>}, {pipeline_mode = #tpu.pipeline_mode<synchronous>, transform_indices = @transform_3, window_bounds = array<i64: 128, 512>}, {pipeline_mode = #tpu.pipeline_mode<synchronous>, transform_indices = @transform_4, window_bounds = array<i64: 1, 512>}, {pipeline_mode = #tpu.pipeline_mode<synchronous>, transform_indices = @transform_5, window_bounds = array<i64: 512, 512>}, {pipeline_mode = #tpu.pipeline_mode<synchronous>, transform_indices = @transform_6, window_bounds = array<i64: 1, 512>}, {pipeline_mode = #tpu.pipeline_mode<synchronous>, transform_indices = @transform_7, window_bounds = array<i64: 512, 128>}, {pipeline_mode = #tpu.pipeline_mode<synchronous>, transform_indices = @transform_8, window_bounds = array<i64: 1, 128>}, {transform_indices = @transform_9, window_bounds = array<i64: 16, 5>}]} {
    %c0 = arith.constant 0 : index
    %c0_0 = arith.constant 0 : index
    %0 = vector.load %arg1[%c0, %c0_0] : memref<16x450xf32, #tpu.memory_space<vmem>>, vector<16x450xf32>
    %1 = arith.truncf %0 : vector<16x450xf32> to vector<16x450xbf16>
    %c0_1 = arith.constant 0 : index
    %c0_2 = arith.constant 0 : index
    %2 = vector.load %arg2[%c0_1, %c0_2] : memref<450x128xbf16, #tpu.memory_space<vmem>>, vector<450x128xbf16>
    %cst = arith.constant dense<0.000000e+00> : vector<16x128xf32>
    %3 = tpu.matmul %1, %2, %cst {dimension_numbers = #tpu.dot_dimension_numbers<[1], [0], [0], [1], [0, 0, 1, 1], [], []>} : vector<16x450xbf16>, vector<450x128xbf16>, vector<16x128xf32> -> vector<16x128xf32>
    %c0_3 = arith.constant 0 : index
    %c0_4 = arith.constant 0 : index
    %4 = vector.load %arg3[%c0_3, %c0_4] : memref<1x128xf32, #tpu.memory_space<vmem>>, vector<1x128xf32>
    %5 = vector.broadcast %4 : vector<1x128xf32> to vector<16x128xf32>
    %6 = arith.addf %3, %5 : vector<16x128xf32>
    %cst_5 = arith.constant 0.000000e+00 : f32
    %7 = vector.broadcast %cst_5 : f32 to vector<16x128xf32>
    %8 = arith.maximumf %6, %7 : vector<16x128xf32>
    %9 = arith.truncf %8 : vector<16x128xf32> to vector<16x128xbf16>
    %c0_6 = arith.constant 0 : index
    %c0_7 = arith.constant 0 : index
    %10 = vector.load %arg4[%c0_6, %c0_7] : memref<128x512xbf16, #tpu.memory_space<vmem>>, vector<128x512xbf16>
    %cst_8 = arith.constant dense<0.000000e+00> : vector<16x512xf32>
    %11 = tpu.matmul %9, %10, %cst_8 {dimension_numbers = #tpu.dot_dimension_numbers<[1], [0], [0], [1], [0, 0, 1, 1], [], []>} : vector<16x128xbf16>, vector<128x512xbf16>, vector<16x512xf32> -> vector<16x512xf32>
    %c0_9 = arith.constant 0 : index
    %c0_10 = arith.constant 0 : index
    %12 = vector.load %arg5[%c0_9, %c0_10] : memref<1x512xf32, #tpu.memory_space<vmem>>, vector<1x512xf32>
    %13 = vector.broadcast %12 : vector<1x512xf32> to vector<16x512xf32>
    %14 = arith.addf %11, %13 : vector<16x512xf32>
    %cst_11 = arith.constant 0.000000e+00 : f32
    %15 = vector.broadcast %cst_11 : f32 to vector<16x512xf32>
    %16 = arith.maximumf %14, %15 : vector<16x512xf32>
    %17 = arith.truncf %16 : vector<16x512xf32> to vector<16x512xbf16>
    %c0_12 = arith.constant 0 : index
    %c0_13 = arith.constant 0 : index
    %18 = vector.load %arg6[%c0_12, %c0_13] : memref<512x512xbf16, #tpu.memory_space<vmem>>, vector<512x512xbf16>
    %cst_14 = arith.constant dense<0.000000e+00> : vector<16x512xf32>
    %19 = tpu.matmul %17, %18, %cst_14 {dimension_numbers = #tpu.dot_dimension_numbers<[1], [0], [0], [1], [0, 0, 1, 1], [], []>} : vector<16x512xbf16>, vector<512x512xbf16>, vector<16x512xf32> -> vector<16x512xf32>
    %c0_15 = arith.constant 0 : index
    %c0_16 = arith.constant 0 : index
    %20 = vector.load %arg7[%c0_15, %c0_16] : memref<1x512xf32, #tpu.memory_space<vmem>>, vector<1x512xf32>
    %21 = vector.broadcast %20 : vector<1x512xf32> to vector<16x512xf32>
    %22 = arith.addf %19, %21 : vector<16x512xf32>
    %cst_17 = arith.constant 0.000000e+00 : f32
    %23 = vector.broadcast %cst_17 : f32 to vector<16x512xf32>
    %24 = arith.maximumf %22, %23 : vector<16x512xf32>
    %25 = arith.truncf %24 : vector<16x512xf32> to vector<16x512xbf16>
    %c0_18 = arith.constant 0 : index
    %c0_19 = arith.constant 0 : index
    %26 = vector.load %arg8[%c0_18, %c0_19] : memref<512x128xbf16, #tpu.memory_space<vmem>>, vector<512x128xbf16>
    %cst_20 = arith.constant dense<0.000000e+00> : vector<16x128xf32>
    %27 = tpu.matmul %25, %26, %cst_20 {dimension_numbers = #tpu.dot_dimension_numbers<[1], [0], [0], [1], [0, 0, 1, 1], [], []>} : vector<16x512xbf16>, vector<512x128xbf16>, vector<16x128xf32> -> vector<16x128xf32>
    %c0_21 = arith.constant 0 : index
    %c0_22 = arith.constant 0 : index
    %28 = vector.load %arg9[%c0_21, %c0_22] : memref<1x128xf32, #tpu.memory_space<vmem>>, vector<1x128xf32>
    %29 = vector.broadcast %28 : vector<1x128xf32> to vector<16x128xf32>
    %30 = arith.addf %27, %29 : vector<16x128xf32>
    %31 = vector.extract_strided_slice %30 {offsets = [0, 0], sizes = [16, 5], strides = [1, 1]} : vector<16x128xf32> to vector<16x5xf32>
    %c0_23 = arith.constant 0 : index
    %c0_24 = arith.constant 0 : index
    %32 = vector.load %arg10[%c0_23, %c0_24] : memref<16x5xf32, #tpu.memory_space<vmem>>, vector<16x5xf32>
    tpu.vector_store %arg10[%c0_23, %c0_24], %31 {strides = array<i32>} : memref<16x5xf32, #tpu.memory_space<vmem>>, vector<16x5xf32>,
    return
  }
  func.func @transform_0(%arg0: i32) -> (i32, i32) {
    %c0_i32 = arith.constant 0 : i32
    %c0_i32_0 = arith.constant 0 : i32
    return %arg0, %c0_i32 : i32, i32
  }
  func.func @transform_1(%arg0: i32) -> (i32, i32) {
    %c0_i32 = arith.constant 0 : i32
    %c0_i32_0 = arith.constant 0 : i32
    %c0_i32_1 = arith.constant 0 : i32
    return %c0_i32, %c0_i32_0 : i32, i32
  }
  func.func @transform_2(%arg0: i32) -> (i32, i32) {
    %c0_i32 = arith.constant 0 : i32
    %c0_i32_0 = arith.constant 0 : i32
    %c0_i32_1 = arith.constant 0 : i32
    return %c0_i32, %c0_i32_0 : i32, i32
  }
  func.func @transform_3(%arg0: i32) -> (i32, i32) {
    %c0_i32 = arith.constant 0 : i32
    %c0_i32_0 = arith.constant 0 : i32
    %c0_i32_1 = arith.constant 0 : i32
    return %c0_i32, %c0_i32_0 : i32, i32
  }
  func.func @transform_4(%arg0: i32) -> (i32, i32) {
    %c0_i32 = arith.constant 0 : i32
    %c0_i32_0 = arith.constant 0 : i32
    %c0_i32_1 = arith.constant 0 : i32
    return %c0_i32, %c0_i32_0 : i32, i32
  }
  func.func @transform_5(%arg0: i32) -> (i32, i32) {
    %c0_i32 = arith.constant 0 : i32
    %c0_i32_0 = arith.constant 0 : i32
    %c0_i32_1 = arith.constant 0 : i32
    return %c0_i32, %c0_i32_0 : i32, i32
  }
  func.func @transform_6(%arg0: i32) -> (i32, i32) {
    %c0_i32 = arith.constant 0 : i32
    %c0_i32_0 = arith.constant 0 : i32
    %c0_i32_1 = arith.constant 0 : i32
    return %c0_i32, %c0_i32_0 : i32, i32
  }
  func.func @transform_7(%arg0: i32) -> (i32, i32) {
    %c0_i32 = arith.constant 0 : i32
    %c0_i32_0 = arith.constant 0 : i32
    %c0_i32_1 = arith.constant 0 : i32
    return %c0_i32, %c0_i32_0 : i32, i32
  }
  func.func @transform_8(%arg0: i32) -> (i32, i32) {
    %c0_i32 = arith.constant 0 : i32
    %c0_i32_0 = arith.constant 0 : i32
    %c0_i32_1 = arith.constant 0 : i32
    return %c0_i32, %c0_i32_0 : i32, i32
  }
  func.func @transform_9(%arg0: i32) -> (i32, i32) {
    %c0_i32 = arith.constant 0 : i32
    %c0_i32_0 = arith.constant 0 : i32
    return %arg0, %c0_i32 : i32, i32
  }
}

</mosaic_0001>

<bundles_post_ra>
// kernel: modelo_bot_forward.1
= control target key start
LH: loop header
LB: loop body
LE: loop exit
PB: predicated region body
PF: predicated region fallthrough
CT: control target
= control target key end

     0   :  { %14 = vsyncpa [#allocation3], 0  ;;  %s3012_s0 = inlined_call_operand.vmem [shape: f32[16,450], index: 0, kind: input, shape index: {}]   ;;  %s3013_s1 = inlined_call_operand.hbm [shape: bf16[450,128], index: 1, kind: input, shape index: {}]   ;;  %s3014_s2 = inlined_call_operand.vmem [shape: f32[1,128], index: 2, kind: input, shape index: {}]   ;;  %s3015_s3 = inlined_call_operand.vmem [shape: bf16[128,512], index: 3, kind: input, shape index: {}]   ;;  %s3016_s4 = inlined_call_operand.vmem [shape: f32[1,512], index: 4, kind: input, shape index: {}]   ;;  %s3017_s5 = inlined_call_operand.hbm [shape: bf16[512,512], index: 5, kind: input, shape index: {}]   ;;  %s3018_s6 = inlined_call_operand.vmem [shape: f32[1,512], index: 6, kind: input, shape index: {}]   ;;  %s3019_s7 = inlined_call_operand.hbm [shape: bf16[512,128], index: 7, kind: input, shape index: {}]   ;;  %s3020_s8 = inlined_call_operand.vmem [shape: f32[1,128], index: 8, kind: input, shape index: {}]   ;;  %s3021_s9 = inlined_call_operand.vmem [shape: f32[16,5], index: 9, kind: output, shape index: {}]  }
   0x1   :  { %15 = vsyncpa [#allocation5], 0  ;;  %s2739_s30 = smov [#allocation4]   ;;  %s2669_s13 = scalar_lea.hbm %s3017_s5, 16384 }
   0x2   :  { %s41_s10 = sshll.u32 %s2739_s30, 4  ;;  %p2670_p0 = scmp.ne.s32.totalorder %s3017_s5, %s2669_s13  ;;  %s42_s10 = int_to_ptr.vmem [resolvable:$true] %s41_s10 }
   0x3   :  { %p2673_p1 = scmp.lt.u32.totalorder %s2669_s13, %s3017_s5 }
   0x5   :  { %p2675_p2 = pnand %p2673_p1, %p2670_p0 }
   0x7   :  { %2678 = shalt.err (!%p2675_p2)
}
   0x8   :  { %s2679_s18 = scalar_lea.vmem %s42_s10, 16384  ;;  %p2684_p4 = scmp.lt.s32.totalorder %s42_s10, %s42_s10 }
   0x9   :  { %p2680_p3 = scmp.ne.s32.totalorder %s42_s10, %s2679_s18  ;;  %p2685_p5 = scmp.lt.s32.totalorder %s2679_s18, %s2679_s18 }
   0xb   :  { %p2686_p6 = por %p2685_p5, %p2684_p4 }
   0xd   :  { %p2687_p7 = pnand %p2686_p6, %p2680_p3 }
   0xf   :  { %2690 = shalt.err (!%p2687_p7)
}
  0x10   :  { %s2740_s19 = smov 256   ;;  %s2741_s20 = smov 16  }
  0x11   :  { %47 = dma.hbm_to_vmem [thread:$0]  %s3017_s5, 16384, %s42_s10, [#allocation5], %s2740_s19, %s2740_s19, %s2741_s20  }
  0x12   :  { %s2742_s23 = smov [#allocation2]   ;;  %s2691_s27 = scalar_lea.hbm %s3013_s1, 3648 }
  0x13   :  { %s23_s24 = sshll.u32 %s2742_s23, 4  ;;  %p2692_p8 = scmp.ne.s32.totalorder %s3013_s1, %s2691_s27  ;;  %s24_s24 = int_to_ptr.vmem [resolvable:$true] %s23_s24 }
  0x14   :  { %p2695_p9 = scmp.lt.u32.totalorder %s2691_s27, %s3013_s1 }
  0x16   :  { %p2697_p10 = pnand %p2695_p9, %p2692_p8 }
  0x18   :  { %2700 = shalt.err (!%p2697_p10)
}
  0x19   :  { %s2701_s12 = scalar_lea.vmem %s24_s24, 3648  ;;  %p2706_p12 = scmp.lt.s32.totalorder %s24_s24, %s24_s24 }
  0x1a   :  { %p2702_p11 = scmp.ne.s32.totalorder %s24_s24, %s2701_s12  ;;  %p2707_p13 = scmp.lt.s32.totalorder %s2701_s12, %s2701_s12 }
  0x1c   :  { %p2708_p0 = por %p2707_p13, %p2706_p12 }
  0x1e   :  { %p2709_p1 = pnand %p2708_p0, %p2702_p11 }
  0x20   :  { %2712 = shalt.err (!%p2709_p1)
}
  0x21   :  { %s2743_s5 = smov 64   ;;  %s2744_s10 = smov 4  }
  0x22   :  { %29 = dma.hbm_to_vmem [thread:$0]  %s3013_s1, 3648, %s24_s24, [#allocation3], %s2743_s5, %s2743_s5, %s2744_s10  }
  0x23   :  { %s2745_s15 = smov [#allocation6]   ;;  %s2713_s19 = scalar_lea.hbm %s3019_s7, 4096 }
  0x24   :  { %s55_s16 = sshll.u32 %s2745_s15, 4  ;;  %p2714_p2 = scmp.ne.s32.totalorder %s3019_s7, %s2713_s19  ;;  %s56_s16 = int_to_ptr.vmem [resolvable:$true] %s55_s16 }
  0x25   :  { %p2717_p3 = scmp.lt.u32.totalorder %s2713_s19, %s3019_s7 }
  0x27   :  { %p2719_p4 = pnand %p2717_p3, %p2714_p2 }
  0x29   :  { %2722 = shalt.err (!%p2719_p4)
}
  0x2a   :  { %s2723_s25 = scalar_lea.vmem %s56_s16, 4096  ;;  %p2728_p6 = scmp.lt.s32.totalorder %s56_s16, %s56_s16 }
  0x2b   :  { %p2724_p5 = scmp.ne.s32.totalorder %s56_s16, %s2723_s25  ;;  %p2729_p7 = scmp.lt.s32.totalorder %s2723_s25, %s2723_s25 }
  0x2d   :  { %p2730_p8 = por %p2729_p7, %p2728_p6 }
  0x2f   :  { %p2731_p9 = pnand %p2730_p8, %p2724_p5 }
  0x31   :  { %2734 = shalt.err (!%p2731_p9)
}
  0x32   :  { %61 = dma.hbm_to_vmem [thread:$0]  %s3019_s7, 4096, %s56_s16, [#allocation5], %s2743_s5, %s2743_s5, %s2744_s10  }
  0x33   :  { %2735 = dma.done.wait [#allocation3], 3648  }
  0x34   :  { %2736 = vsyncadd [#allocation3], 4294963648 }
  0x35   :  { %2737 = dma.done.wait [#allocation5], 20480  }
  0x36   :  { %2738 = vsyncadd [#allocation5], 4294946816  ;;  %v2746_v0 = vmov 0   ;;  %v2368_v1 = vld [vmem:[#allocation2 + $0x80] sm:$0xff]   ;;  %v2369_v2 = vld [vmem:[#allocation2 + $0x88] sm:$0xff]   ;;  %vm321_vm0 = vcmask 539648  }
  0x37   :  { %370 = vmatprep.subr.bf16.mxu1 %v2746_v0  ;;  %v2371_v3 = vld [vmem:[#allocation2 + $0x40] sm:$0xff]   ;;  %v2370_v5 = vld [vmem:[#allocation2 + $0x90] sm:$0xff]   ;;  %v2374_v6 = vld [vmem:[#allocation2 + $0x48] sm:$0xff]   ;;  %vm325_vm1 = vcmask 1040384   ;;  %vm2045_vm2 = vcmask 39936  }
  0x38   :  { %371 = vmatpush1.bf16.msra.mxu1 %v2368_v1  ;;  %v2372_v4 = vld [vmem:[#allocation2] sm:$0xff]   ;;  %2278 = vmatprep.subr.bf16.mxu0 %v2371_v3  ;;  %v2375_v7 = vld [vmem:[#allocation2 + $0x8] sm:$0xff]   ;;  %v2373_v8 = vld [vmem:[#allocation2 + $0x98] sm:$0xff]  }
  0x39   :  { %372 = vmatprep.subr.bf16.mxu1 %v2746_v0  ;;  %2279 = vmatpush3.bf16.msra.mxu0 %v2372_v4  ;;  %v2377_v9 = vld [vmem:[#allocation2 + $0x50] sm:$0xff]   ;;  %v2380_v11 = vld [vmem:[#allocation2 + $0x58] sm:$0xff]   ;;  %v2376_v12 = vld [vmem:[#allocation2 + $0xa0] sm:$0xff]  }
  0x3a   :  { %2280 = vmatprep.subr.bf16.mxu0 %v2374_v6  ;;  %v2378_v10 = vld [vmem:[#allocation2 + $0x10] sm:$0xff]   ;;  %v2381_v13 = vld [vmem:[#allocation2 + $0x18] sm:$0xff]   ;;  %v2383_v14 = vld [vmem:[#allocation2 + $0x60] sm:$0xff]  }
  0x3b   :  { %v2379_v15 = vld [vmem:[#allocation2 + $0xa8] sm:$0xff]   ;;  %v2384_v16 = vld [vmem:[#allocation2 + $0x20] sm:$0xff]   ;;  %v2382_v18 = vld [vmem:[#allocation2 + $0xb0] sm:$0xff]  }
  0x3c   :  { %373 = vmatpush1.bf16.msra.mxu1 %v2369_v2  ;;  %v2386_v17 = vld [vmem:[#allocation2 + $0x68] sm:$0xff]   ;;  %v2389_v20 = vld [vmem:[#allocation2 + $0x70] sm:$0xff]   ;;  %v2385_v21 = vld [vmem:[#allocation2 + $0xb8] sm:$0xff]  }
  0x3d   :  { %374 = vmatprep.subr.bf16.mxu1 %v2746_v0  ;;  %2281 = vmatpush3.bf16.msra.mxu0 %v2375_v7  ;;  %v2387_v19 = vld [vmem:[#allocation2 + $0x28] sm:$0xff]   ;;  %v2390_v22 = vld [vmem:[#allocation2 + $0x30] sm:$0xff]   ;;  %v2392_v23 = vld [vmem:[#allocation2 + $0x78] sm:$0xff]  }
  0x3e   :  { %2282 = vmatprep.subr.bf16.mxu0 %v2377_v9  ;;  %v75_v24 = vld [vmem:[%s3012_s0 + $0x8] sm:$0xff]  ;;  %v2388_v26 = vld [vmem:[#allocation2 + $0xc0] sm:$0xff]   ;;  %v2393_v28 = vld [vmem:[#allocation2 + $0x38] sm:$0xff]  }
  0x3f   :  { %v79_v25 = vld [vmem:[%s3012_s0 + $0x28] sm:$0xff]  ;;  %v74_v29 = vld [vmem:[%s3012_s0] sm:$0xff]  ;;  %v77_v31 = vld [vmem:[%s3012_s0 + $0x18] sm:$0xff] }
  0x40   :  { %375 = vmatpush1.bf16.msra.mxu1 %v2370_v5  ;;  %v83_v27 = vpack.c.bf16 %v79_v25, %v75_v24  ;;  %v78_v30 = vld [vmem:[%s3012_s0 + $0x20] sm:$0xff]  ;;  %v81_v32 = vld [vmem:[%s3012_s0 + $0x38] sm:$0xff]  ;;  %v2391_v35 = vld [vmem:[#allocation2 + $0xc8] sm:$0xff]  }
  0x41   :  { %376 = vmatprep.subr.bf16.mxu1 %v2746_v0  ;;  %2283 = vmatpush3.bf16.msra.mxu0 %v2378_v10  ;;  %v85_v33 = vpack.c.bf16 %v81_v32, %v77_v31  ;;  %v2399_v34 = vld [vmem:[%s3015_s3 + $0x4] ss:$16 sps:$4 sm:$0xff]   ;;  %v82_v36 = vpack.c.bf16 %v78_v30, %v74_v29  ;;  %v2397_v37 = vld [vmem:[%s3015_s3] ss:$16 sps:$4 sm:$0xff]   ;;  %v2395_v42 = vld [vmem:[#allocation2 + $0xd8] sm:$0xff]  }
  0x42   :  { %2284 = vmatprep.subr.bf16.mxu0 %v2380_v11  ;;  %361 = vmatprep.mubr.bf16.mxu0 %v83_v27  ;;  %v2405_v38 = vld [vmem:[%s3015_s3 + $0x24] ss:$16 sps:$4 sm:$0xff]   ;;  %v2403_v40 = vld [vmem:[%s3015_s3 + $0x20] ss:$16 sps:$4 sm:$0xff]   ;;  %v2402_v49 = vld [vmem:[%s3015_s3 + $0xc] ss:$16 sps:$4 sm:$0xff]  }
  0x43   :  { %2084 = vmatprep.mubr.msk.bf16.mxu1 %vm321_vm0, %v85_v33  ;;  %v2394_v39 = vld [vmem:[#allocation2 + $0xd0] sm:$0xff]   ;;  %v2396_v43 = vld [vmem:[#allocation2 + $0xe0] ss:$0 sps:$4 sm:$0x11]   ;;  %v2400_v51 = vld [vmem:[%s3015_s3 + $0x8] ss:$16 sps:$4 sm:$0xff]  }
  0x44   :  { %377 = vmatpush1.bf16.msra.mxu1 %v2373_v8  ;;  %v2411_v41 = vld [vmem:[%s3015_s3 + $0x44] ss:$16 sps:$4 sm:$0xff]   ;;  %v2409_v44 = vld [vmem:[%s3015_s3 + $0x40] ss:$16 sps:$4 sm:$0xff]   ;;  %v327_v50 = vsel %vm325_vm1, %v2396_v43, 0 }
  0x45   :  { %378 = vmatprep.subr.bf16.mxu1 %v2746_v0  ;;  %2285 = vmatpush3.bf16.msra.mxu0 %v2381_v13  ;;  %v2417_v45 = vld [vmem:[%s3015_s3 + $0x64] ss:$16 sps:$4 sm:$0xff]   ;;  %v2415_v48 = vld [vmem:[%s3015_s3 + $0x60] ss:$16 sps:$4 sm:$0xff]   ;;  %v2408_v53 = vld [vmem:[%s3015_s3 + $0x2c] ss:$16 sps:$4 sm:$0xff]  }
  0x46   :  { %2286 = vmatprep.subr.bf16.mxu0 %v2383_v14  ;;  %v76_v46 = vld [vmem:[%s3012_s0 + $0x10] sm:$0xff]  ;;  %v2406_v54 = vld [vmem:[%s3015_s3 + $0x28] ss:$16 sps:$4 sm:$0xff]   ;;  %v2414_v55 = vld [vmem:[%s3015_s3 + $0x4c] ss:$16 sps:$4 sm:$0xff]  }
  0x47   :  { %v80_v47 = vld [vmem:[%s3012_s0 + $0x30] sm:$0xff]  ;;  %v2412_v56 = vld [vmem:[%s3015_s3 + $0x48] ss:$16 sps:$4 sm:$0xff]   ;;  %v2420_v57 = vld [vmem:[%s3015_s3 + $0x6c] ss:$16 sps:$4 sm:$0xff]  }
  0x48   :  { %379 = vmatpush1.bf16.msra.mxu1 %v2376_v12  ;;  %v84_v52 = vpack.c.bf16 %v80_v47, %v76_v46  ;;  %v2418_v58 = vld [vmem:[%s3015_s3 + $0x68] ss:$16 sps:$4 sm:$0xff]   ;;  %v2421_v59 = vld [vmem:[%s3015_s3 + $0x80] ss:$16 sps:$4 sm:$0xff]   ;;  %v2423_v60 = vld [vmem:[%s3015_s3 + $0x84] ss:$16 sps:$4 sm:$0xff]  }
  0x49   :  { %380 = vmatprep.subr.bf16.mxu1 %v2746_v0  ;;  %2287 = vmatpush3.bf16.msra.mxu0 %v2384_v16  ;;  %v2424_v61 = vld [vmem:[%s3015_s3 + $0x88] ss:$16 sps:$4 sm:$0xff]   ;;  %v2426_v62 = vld [vmem:[%s3015_s3 + $0x8c] ss:$16 sps:$4 sm:$0xff]   ;;  %v2429_v63 = vld [vmem:[%s3015_s3 + $0xa4] ss:$16 sps:$4 sm:$0xff]  }
  0x4a   :  { %2288 = vmatprep.subr.bf16.mxu0 %v2386_v17  ;;  %v2432_v1 = vld [vmem:[%s3015_s3 + $0xac] ss:$16 sps:$4 sm:$0xff]   ;;  %v2430_v2 = vld [vmem:[%s3015_s3 + $0xa8] ss:$16 sps:$4 sm:$0xff]   ;;  %v2435_v3 = vld [vmem:[%s3015_s3 + $0xc4] ss:$16 sps:$4 sm:$0xff]  }
  0x4b   :  { %v2438_v4 = vld [vmem:[%s3015_s3 + $0xcc] ss:$16 sps:$4 sm:$0xff]   ;;  %v2433_v5 = vld [vmem:[%s3015_s3 + $0xc0] ss:$16 sps:$4 sm:$0xff]   ;;  %v2436_v6 = vld [vmem:[%s3015_s3 + $0xc8] ss:$16 sps:$4 sm:$0xff]  }
  0x4c   :  { %381 = vmatpush1.bf16.msra.mxu1 %v2379_v15  ;;  %v2441_v7 = vld [vmem:[%s3015_s3 + $0xe4] ss:$16 sps:$4 sm:$0xff]   ;;  %v2444_v8 = vld [vmem:[%s3015_s3 + $0xec] ss:$16 sps:$4 sm:$0xff]   ;;  %v2439_v9 = vld [vmem:[%s3015_s3 + $0xe0] ss:$16 sps:$4 sm:$0xff]  }
  0x4d   :  { %382 = vmatprep.subr.bf16.mxu1 %v2746_v0  ;;  %2289 = vmatpush3.bf16.msra.mxu0 %v2387_v19  ;;  %v2442_v10 = vld [vmem:[%s3015_s3 + $0xe8] ss:$16 sps:$4 sm:$0xff]   ;;  %v2450_v12 = vld [vmem:[#allocation4 + $0xc] ss:$16 sps:$4 sm:$0xff]   ;;  %v2445_v30 = vld [vmem:[#allocation4] ss:$16 sps:$4 sm:$0xff]  }
  0x4e   :  { %2290 = vmatprep.subr.bf16.mxu0 %v2389_v20  ;;  %v2447_v11 = vld [vmem:[#allocation4 + $0x4] ss:$16 sps:$4 sm:$0xff]   ;;  %v2054_v19 = vld [vmem:[%s3014_s2] ss:$0 sm:$0xff]  ;;  %v2448_v31 = vld [vmem:[#allocation4 + $0x8] ss:$16 sps:$4 sm:$0xff]  }
  0x4f   :  { %v2453_v33 = vld [vmem:[#allocation4 + $0x24] ss:$16 sps:$4 sm:$0xff]   ;;  %v2463_v43 = vld [vmem:[#allocation4 + $0x60] ss:$16 sps:$4 sm:$0xff]   ;;  %v2474_v46 = vld [vmem:[#allocation4 + $0x8c] ss:$16 sps:$4 sm:$0xff]  }
  0x50   :  { %383 = vmatpush1.bf16.msra.mxu1 %v2382_v18  ;;  %v2469_v47 = vld [vmem:[#allocation4 + $0x80] ss:$16 sps:$4 sm:$0xff]  }
  0x51   :  { %384 = vmatprep.subr.bf16.mxu1 %v2746_v0  ;;  %2291 = vmatpush3.bf16.msra.mxu0 %v2390_v22 }
  0x52   :  { %2292 = vmatprep.subr.bf16.mxu0 %v2392_v23 }
  0x54   :  { %385 = vmatpush1.bf16.msra.mxu1 %v2385_v21 }
  0x55   :  { %386 = vmatprep.subr.bf16.mxu1 %v2746_v0  ;;  %2293 = vmatpush3.bf16.msra.mxu0 %v2393_v28 }
  0x56   :  { %628 = vmatprep.subr.bf16.mxu0 %v2399_v34  ;;  %v2456_v34 = vld [vmem:[#allocation4 + $0x2c] ss:$16 sps:$4 sm:$0xff]  }
  0x58   :  { %387 = vmatpush1.bf16.msra.mxu1 %v2388_v26  ;;  %362 = vmatmul.mubr.bf16.vlgmr.msra.gmra.mrb[0].mxu0 %v82_v36  ;;  %v2454_v36 = vld [vmem:[#allocation4 + $0x28] ss:$16 sps:$4 sm:$0xff]  }
  0x59   :  { %388 = vmatprep.subr.bf16.mxu1 %v2746_v0  ;;  %629 = vmatpush1.bf16.msra.mxu0 %v2397_v37  ;;  %v2459_v37 = vld [vmem:[#allocation4 + $0x44] ss:$16 sps:$4 sm:$0xff]  }
  0x5a   :  { %630 = vmatprep.subr.bf16.mxu0 %v2405_v38  ;;  %660 = vmatprep.mubr.bf16.mxu0 %v2746_v0  ;;  %v2462_v38 = vld [vmem:[#allocation4 + $0x4c] ss:$16 sps:$4 sm:$0xff]  }
  0x5c   :  { %389 = vmatpush1.bf16.msra.mxu1 %v2391_v35  ;;  %v2451_v35 = vld [vmem:[#allocation4 + $0x20] ss:$16 sps:$4 sm:$0xff]  }
  0x5d   :  { %390 = vmatprep.subr.bf16.mxu1 %v2746_v0  ;;  %631 = vmatpush1.bf16.msra.mxu0 %v2403_v40  ;;  %v2460_v40 = vld [vmem:[#allocation4 + $0x48] ss:$16 sps:$4 sm:$0xff]  }
  0x5e   :  { %632 = vmatprep.subr.bf16.mxu0 %v2411_v41  ;;  %v2465_v41 = vld [vmem:[#allocation4 + $0x64] ss:$16 sps:$4 sm:$0xff]  }
  0x60   :  { %391 = vmatpush1.bf16.msra.mxu1 %v2394_v39  ;;  %v2457_v39 = vld [vmem:[#allocation4 + $0x40] ss:$16 sps:$4 sm:$0xff]  }
  0x61   :  { %392 = vmatprep.subr.bf16.mxu1 %v2746_v0  ;;  %633 = vmatpush1.bf16.msra.mxu0 %v2409_v44  ;;  %v2466_v44 = vld [vmem:[#allocation4 + $0x68] ss:$16 sps:$4 sm:$0xff]  }
  0x62   :  { %634 = vmatprep.subr.bf16.mxu0 %v2417_v45  ;;  %v2471_v45 = vld [vmem:[#allocation4 + $0x84] ss:$16 sps:$4 sm:$0xff]  }
  0x64   :  { %393 = vmatpush1.bf16.msra.mxu1 %v2395_v42  ;;  %v2468_v42 = vld [vmem:[#allocation4 + $0x6c] ss:$16 sps:$4 sm:$0xff]  }
  0x65   :  { %394 = vmatprep.subr.bf16.mxu1 %v2746_v0  ;;  %635 = vmatpush1.bf16.msra.mxu0 %v2415_v48  ;;  %v2472_v48 = vld [vmem:[#allocation4 + $0x88] ss:$16 sps:$4 sm:$0xff]  }
  0x66   :  { %636 = vmatprep.subr.bf16.mxu0 %v2423_v60  ;;  %v2490_v60 = vld [vmem:[#allocation4 + $0xe8] ss:$16 sps:$4 sm:$0xff]  }
  0x68   :  { %395 = vmatpush1.bf16.msra.mxu1 %v327_v50  ;;  %v2480_v50 = vld [vmem:[#allocation4 + $0xac] ss:$16 sps:$4 sm:$0xff]  }
  0x69   :  { %671 = vmatprep.subr.bf16.mxu1 %v2402_v49  ;;  %637 = vmatpush1.bf16.msra.mxu0 %v2421_v59  ;;  %v2477_v49 = vld [vmem:[#allocation4 + $0xa4] ss:$16 sps:$4 sm:$0xff]   ;;  %v2487_v59 = vld [vmem:[#allocation4 + $0xe0] ss:$16 sps:$4 sm:$0xff]  }
  0x6a   :  { %638 = vmatprep.subr.bf16.mxu0 %v2429_v63  ;;  %v2493_v63 = vld [vmem:[#allocation4 + $0x100] ss:$16 sps:$4 sm:$0xff]  }
  0x6b   :  { %403 = vmatmul.mubr.bf16.vlgmr.msra.gmra.mrb[0].mxu1 %v84_v52  ;;  %v2478_v52 = vld [vmem:[#allocation4 + $0xa8] ss:$16 sps:$4 sm:$0xff]  }
  0x6c   :  { %672 = vmatpush1.bf16.msra.mxu1 %v2400_v51  ;;  %703 = vmatprep.mubr.bf16.mxu1 %v2746_v0  ;;  %v2427_v0 = vld [vmem:[%s3015_s3 + $0xa0] ss:$16 sps:$4 sm:$0xff]   ;;  %v2475_v51 = vld [vmem:[#allocation4 + $0xa0] ss:$16 sps:$4 sm:$0xff]  }
  0x6d   :  { %673 = vmatprep.subr.bf16.mxu1 %v2408_v53  ;;  %639 = vmatpush1.bf16.msra.mxu0 %v2427_v0  ;;  %v2483_v53 = vld [vmem:[#allocation4 + $0xc4] ss:$16 sps:$4 sm:$0xff]   ;;  %v2496_v0 = vld [vmem:[#allocation4 + $0x108] ss:$16 sps:$4 sm:$0xff]  }
  0x6e   :  { %640 = vmatprep.subr.bf16.mxu0 %v2435_v3  ;;  %v2499_v3 = vld [vmem:[#allocation4 + $0x120] ss:$16 sps:$4 sm:$0xff]  }
  0x70   :  { %674 = vmatpush1.bf16.msra.mxu1 %v2406_v54  ;;  %v2486_v54 = vld [vmem:[#allocation4 + $0xcc] ss:$16 sps:$4 sm:$0xff]  }
  0x71   :  { %675 = vmatprep.subr.bf16.mxu1 %v2414_v55  ;;  %641 = vmatpush1.bf16.msra.mxu0 %v2433_v5  ;;  %v2481_v55 = vld [vmem:[#allocation4 + $0xc0] ss:$16 sps:$4 sm:$0xff]   ;;  %v2507_v5 = vld [vmem:[#allocation4 + $0x144] ss:$16 sps:$4 sm:$0xff]  }
  0x72   :  { %642 = vmatprep.subr.bf16.mxu0 %v2441_v7  ;;  %v2505_v7 = vld [vmem:[#allocation4 + $0x140] ss:$16 sps:$4 sm:$0xff]  }
  0x74   :  { %676 = vmatpush1.bf16.msra.mxu1 %v2412_v56  ;;  %v2484_v56 = vld [vmem:[#allocation4 + $0xc8] ss:$16 sps:$4 sm:$0xff]  }
  0x75   :  { %677 = vmatprep.subr.bf16.mxu1 %v2420_v57  ;;  %643 = vmatpush1.bf16.msra.mxu0 %v2439_v9  ;;  %v2489_v57 = vld [vmem:[#allocation4 + $0xe4] ss:$16 sps:$4 sm:$0xff]  }
  0x76   :  { %1516 = vmatprep.subr.bf16.mxu0 %v2447_v11  ;;  %v2513_v9 = vld [vmem:[#allocation4 + $0x164] ss:$16 sps:$4 sm:$0xff]   ;;  %v2511_v11 = vld [vmem:[#allocation4 + $0x160] ss:$16 sps:$4 sm:$0xff]  }
  0x78   :  { %678 = vmatpush1.bf16.msra.mxu1 %v2418_v58  ;;  %v2492_v58 = vld [vmem:[#allocation4 + $0xec] ss:$16 sps:$4 sm:$0xff]  }
  0x79   :  { %679 = vmatprep.subr.bf16.mxu1 %v2426_v62  ;;  %v2498_v62 = vld [vmem:[#allocation4 + $0x10c] ss:$16 sps:$4 sm:$0xff]  }
  0x7c   :  { %680 = vmatpush1.bf16.msra.mxu1 %v2424_v61  ;;  %v2495_v61 = vld [vmem:[#allocation4 + $0x104] ss:$16 sps:$4 sm:$0xff]  }
  0x7d   :  { %681 = vmatprep.subr.bf16.mxu1 %v2432_v1  ;;  %v2501_v1 = vld [vmem:[#allocation4 + $0x124] ss:$16 sps:$4 sm:$0xff]  }
  0x80   :  { %682 = vmatpush1.bf16.msra.mxu1 %v2430_v2  ;;  %v2504_v2 = vld [vmem:[#allocation4 + $0x12c] ss:$16 sps:$4 sm:$0xff]  }
  0x81   :  { %683 = vmatprep.subr.bf16.mxu1 %v2438_v4  ;;  %v2502_v4 = vld [vmem:[#allocation4 + $0x128] ss:$16 sps:$4 sm:$0xff]  }
  0x84   :  { %684 = vmatpush1.bf16.msra.mxu1 %v2436_v6  ;;  %v2510_v6 = vld [vmem:[#allocation4 + $0x14c] ss:$16 sps:$4 sm:$0xff]  }
  0x85   :  { %685 = vmatprep.subr.bf16.mxu1 %v2444_v8  ;;  %v2508_v8 = vld [vmem:[#allocation4 + $0x148] ss:$16 sps:$4 sm:$0xff]  }
  0x88   :  { %686 = vmatpush1.bf16.msra.mxu1 %v2442_v10  ;;  %v2516_v10 = vld [vmem:[#allocation4 + $0x16c] ss:$16 sps:$4 sm:$0xff]  }
  0x89   :  { %1602 = vmatprep.subr.bf16.mxu1 %v2450_v12  ;;  %v2514_v12 = vld [vmem:[#allocation4 + $0x168] ss:$16 sps:$4 sm:$0xff]  }
 0x12b   :  { %v2294_v13 = vpop.f32.mrb[0].mxu0 }
 0x12c   :  { %v2295_v14 = vpop.f32.mrb[1].mxu0 }
 0x12d   :  { %v2296_v15 = vadd.f32 %v2295_v14, %v2294_v13  ;;  %v2297_v16 = vpop.f32.mrb[2].mxu0  ;;  %v2519_v13 = vld [vmem:[#allocation4 + $0x184] ss:$16 sps:$4 sm:$0xff]   ;;  %v2522_v14 = vld [vmem:[#allocation4 + $0x18c] ss:$16 sps:$4 sm:$0xff]  }
 0x12e   :  { %v2298_v17 = vpop.f32.mrb[3].mxu0 }
 0x12f   :  { %v2299_v18 = vadd.f32 %v2298_v17, %v2297_v16  ;;  %v364_v20 = vadd.f32 %v2296_v15, %v2054_v19  ;;  %v2517_v15 = vld [vmem:[#allocation4 + $0x180] ss:$16 sps:$4 sm:$0xff]   ;;  %v2520_v16 = vld [vmem:[#allocation4 + $0x188] ss:$16 sps:$4 sm:$0xff]   ;;  %v2525_v17 = vld [vmem:[#allocation4 + $0x1a4] ss:$16 sps:$4 sm:$0xff]  }
 0x131   :  { %v367_v24 = vadd.f32 %v2299_v18, %v2054_v19  ;;  %v2528_v18 = vld [vmem:[#allocation4 + $0x1ac] ss:$16 sps:$4 sm:$0xff]   ;;  %v2523_v19 = vld [vmem:[#allocation4 + $0x1a0] ss:$16 sps:$4 sm:$0xff]  }
 0x13e   :  { %v404_v21 = vpop.f32.mrb[0].mxu1 }
 0x13f   :  { %v405_v22 = vadd.f32 %v404_v21, %v364_v20  ;;  %v406_v23 = vpop.f32.mrb[1].mxu1  ;;  %v2526_v20 = vld [vmem:[#allocation4 + $0x1a8] ss:$16 sps:$4 sm:$0xff]   ;;  %v2531_v21 = vld [vmem:[#allocation4 + $0x1c4] ss:$16 sps:$4 sm:$0xff]  }
 0x140   :  { %v407_v25 = vpop.f32.mrb[2].mxu1  ;;  %v2529_v23 = vld [vmem:[#allocation4 + $0x1c0] ss:$16 sps:$4 sm:$0xff]  }
 0x141   :  { %v408_v26 = vadd.f32 %v407_v25, %v367_v24  ;;  %v409_v27 = vpop.f32.mrb[3].mxu1  ;;  %v411_v28 = vmax.f32 %v405_v22, 0.0  ;;  %v2534_v22 = vld [vmem:[#allocation4 + $0x1cc] ss:$16 sps:$4 sm:$0xff]   ;;  %v2532_v24 = vld [vmem:[#allocation4 + $0x1c8] ss:$16 sps:$4 sm:$0xff]  }
 0x142   :  { %v2537_v25 = vld [vmem:[#allocation4 + $0x1e4] ss:$16 sps:$4 sm:$0xff]   ;;  %v2535_v27 = vld [vmem:[#allocation4 + $0x1e0] ss:$16 sps:$4 sm:$0xff]  }
 0x143   :  { %v412_v29 = vmax.f32 %v408_v26, 0.0  ;;  %v2540_v26 = vld [vmem:[#allocation4 + $0x1ec] ss:$16 sps:$4 sm:$0xff]  }
 0x145   :  { %v413_v32 = vpack.c.bf16 %v412_v29, %v411_v28  ;;  %v2538_v28 = vld [vmem:[#allocation4 + $0x1e8] ss:$16 sps:$4 sm:$0xff]   ;;  %v2543_v29 = vld [vmem:[#allocation4 + $0x204] ss:$16 sps:$4 sm:$0xff]  }
 0x147   :  { %661 = vmatmul.mubr.bf16.vlgmr.msra.gmra.mrb[4].mxu0 %v413_v32  ;;  %704 = vmatmul.mubr.bf16.vlgmr.msra.gmra.mrb[4].mxu1 %v413_v32 }
 0x148   :  { %1517 = vmatpush1.bf16.msra.mxu0 %v2445_v30  ;;  %1603 = vmatpush1.bf16.msra.mxu1 %v2448_v31  ;;  %v2546_v30 = vld [vmem:[#allocation4 + $0x20c] ss:$16 sps:$4 sm:$0xff]   ;;  %v448_v31 = vlaneseq }
 0x149   :  { %1518 = vmatprep.subr.bf16.mxu0 %v2453_v33  ;;  %1604 = vmatprep.subr.bf16.mxu1 %v2456_v34 }
 0x14a   :  { %v2971_v32 = vshrl.u32 %v448_v31, 7  ;;  %v2580_v31 = vld [vmem:[#allocation4 + $0x2c8] ss:$16 sps:$4 sm:$0xff]  }
 0x14c   :  { %1519 = vmatpush1.bf16.msra.mxu0 %v2451_v35  ;;  %1605 = vmatpush1.bf16.msra.mxu1 %v2454_v36  ;;  %v450_v33 = vsub.s32 0, %v2971_v32  ;;  %v458_v34 = vsub.s32 2, %v2971_v32  ;;  %v446_v35 = vld [vmem:[%s3016_s4] sm:$0xf]  ;;  %v454_v36 = vsub.s32 1, %v2971_v32 }
 0x14d   :  { %1520 = vmatprep.subr.bf16.mxu0 %v2459_v37  ;;  %1606 = vmatprep.subr.bf16.mxu1 %v2462_v38  ;;  %v462_v37 = vsub.s32 3, %v2971_v32 }
 0x14e   :  { %v451_v38 = vrot.slane %v446_v35, %v450_v33 }
 0x150   :  { %1521 = vmatpush1.bf16.msra.mxu0 %v2457_v39  ;;  %1607 = vmatpush1.bf16.msra.mxu1 %v2460_v40  ;;  %v459_v39 = vrot.slane %v446_v35, %v458_v34  ;;  %v455_v40 = vrot.slane %v446_v35, %v454_v36 }
 0x151   :  { %1522 = vmatprep.subr.bf16.mxu0 %v2465_v41  ;;  %1608 = vmatprep.subr.bf16.mxu1 %v2468_v42  ;;  %v463_v41 = vrot.slane %v446_v35, %v462_v37  ;;  %v2585_v35 = vld [vmem:[#allocation4 + $0x2e4] ss:$16 sps:$4 sm:$0xff]  }
 0x154   :  { %1523 = vmatpush1.bf16.msra.mxu0 %v2463_v43  ;;  %1609 = vmatpush1.bf16.msra.mxu1 %v2466_v44 }
 0x155   :  { %1524 = vmatprep.subr.bf16.mxu0 %v2471_v45  ;;  %1610 = vmatprep.subr.bf16.mxu1 %v2474_v46 }
 0x158   :  { %1525 = vmatpush1.bf16.msra.mxu0 %v2469_v47  ;;  %1611 = vmatpush1.bf16.msra.mxu1 %v2472_v48 }
 0x159   :  { %1526 = vmatprep.subr.bf16.mxu0 %v2477_v49  ;;  %1612 = vmatprep.subr.bf16.mxu1 %v2480_v50 }
 0x15c   :  { %1527 = vmatpush1.bf16.msra.mxu0 %v2475_v51  ;;  %1613 = vmatpush1.bf16.msra.mxu1 %v2478_v52 }
 0x15d   :  { %1528 = vmatprep.subr.bf16.mxu0 %v2483_v53  ;;  %1614 = vmatprep.subr.bf16.mxu1 %v2486_v54 }
 0x160   :  { %1529 = vmatpush1.bf16.msra.mxu0 %v2481_v55  ;;  %1615 = vmatpush1.bf16.msra.mxu1 %v2484_v56 }
 0x161   :  { %1530 = vmatprep.subr.bf16.mxu0 %v2489_v57  ;;  %1616 = vmatprep.subr.bf16.mxu1 %v2492_v58 }
 0x164   :  { %1531 = vmatpush1.bf16.msra.mxu0 %v2487_v59  ;;  %1617 = vmatpush1.bf16.msra.mxu1 %v2490_v60 }
 0x165   :  { %1532 = vmatprep.subr.bf16.mxu0 %v2495_v61  ;;  %1618 = vmatprep.subr.bf16.mxu1 %v2498_v62 }
 0x168   :  { %1533 = vmatpush1.bf16.msra.mxu0 %v2493_v63  ;;  %1619 = vmatpush1.bf16.msra.mxu1 %v2496_v0 }
 0x169   :  { %1534 = vmatprep.subr.bf16.mxu0 %v2501_v1  ;;  %1620 = vmatprep.subr.bf16.mxu1 %v2504_v2 }
 0x16c   :  { %1535 = vmatpush1.bf16.msra.mxu0 %v2499_v3  ;;  %1621 = vmatpush1.bf16.msra.mxu1 %v2502_v4 }
 0x16d   :  { %1536 = vmatprep.subr.bf16.mxu0 %v2507_v5  ;;  %1622 = vmatprep.subr.bf16.mxu1 %v2510_v6  ;;  %v2541_v6 = vld [vmem:[#allocation4 + $0x200] ss:$16 sps:$4 sm:$0xff]  }
 0x170   :  { %1537 = vmatpush1.bf16.msra.mxu0 %v2505_v7  ;;  %1623 = vmatpush1.bf16.msra.mxu1 %v2508_v8  ;;  %v2544_v7 = vld [vmem:[#allocation4 + $0x208] ss:$16 sps:$4 sm:$0xff]   ;;  %v2549_v8 = vld [vmem:[#allocation4 + $0x224] ss:$16 sps:$4 sm:$0xff]  }
 0x171   :  { %1538 = vmatprep.subr.bf16.mxu0 %v2513_v9  ;;  %1624 = vmatprep.subr.bf16.mxu1 %v2516_v10  ;;  %v2552_v9 = vld [vmem:[#allocation4 + $0x22c] ss:$16 sps:$4 sm:$0xff]   ;;  %v2547_v10 = vld [vmem:[#allocation4 + $0x220] ss:$16 sps:$4 sm:$0xff]  }
 0x174   :  { %1539 = vmatpush1.bf16.msra.mxu0 %v2511_v11  ;;  %1625 = vmatpush1.bf16.msra.mxu1 %v2514_v12  ;;  %v2550_v11 = vld [vmem:[#allocation4 + $0x228] ss:$16 sps:$4 sm:$0xff]   ;;  %v2555_v12 = vld [vmem:[#allocation4 + $0x244] ss:$16 sps:$4 sm:$0xff]  }
 0x175   :  { %1540 = vmatprep.subr.bf16.mxu0 %v2519_v13  ;;  %1626 = vmatprep.subr.bf16.mxu1 %v2522_v14  ;;  %v2558_v13 = vld [vmem:[#allocation4 + $0x24c] ss:$16 sps:$4 sm:$0xff]   ;;  %v2553_v14 = vld [vmem:[#allocation4 + $0x240] ss:$16 sps:$4 sm:$0xff]  }
 0x178   :  { %1541 = vmatpush1.bf16.msra.mxu0 %v2517_v15  ;;  %1627 = vmatpush1.bf16.msra.mxu1 %v2520_v16  ;;  %v2556_v15 = vld [vmem:[#allocation4 + $0x248] ss:$16 sps:$4 sm:$0xff]   ;;  %v2561_v16 = vld [vmem:[#allocation4 + $0x264] ss:$16 sps:$4 sm:$0xff]  }
 0x179   :  { %1542 = vmatprep.subr.bf16.mxu0 %v2525_v17  ;;  %1628 = vmatprep.subr.bf16.mxu1 %v2528_v18  ;;  %v2564_v17 = vld [vmem:[#allocation4 + $0x26c] ss:$16 sps:$4 sm:$0xff]   ;;  %v2559_v18 = vld [vmem:[#allocation4 + $0x260] ss:$16 sps:$4 sm:$0xff]  }
 0x17c   :  { %1543 = vmatpush1.bf16.msra.mxu0 %v2523_v19  ;;  %1629 = vmatpush1.bf16.msra.mxu1 %v2526_v20  ;;  %v2562_v19 = vld [vmem:[#allocation4 + $0x268] ss:$16 sps:$4 sm:$0xff]   ;;  %v2567_v20 = vld [vmem:[#allocation4 + $0x284] ss:$16 sps:$4 sm:$0xff]  }
 0x17d   :  { %1544 = vmatprep.subr.bf16.mxu0 %v2531_v21  ;;  %1630 = vmatprep.subr.bf16.mxu1 %v2534_v22  ;;  %v2570_v21 = vld [vmem:[#allocation4 + $0x28c] ss:$16 sps:$4 sm:$0xff]   ;;  %v2565_v22 = vld [vmem:[#allocation4 + $0x280] ss:$16 sps:$4 sm:$0xff]  }
 0x180   :  { %1545 = vmatpush1.bf16.msra.mxu0 %v2529_v23  ;;  %1631 = vmatpush1.bf16.msra.mxu1 %v2532_v24  ;;  %v2568_v23 = vld [vmem:[#allocation4 + $0x288] ss:$16 sps:$4 sm:$0xff]   ;;  %v2573_v24 = vld [vmem:[#allocation4 + $0x2a4] ss:$16 sps:$4 sm:$0xff]  }
 0x181   :  { %1546 = vmatprep.subr.bf16.mxu0 %v2537_v25  ;;  %1632 = vmatprep.subr.bf16.mxu1 %v2540_v26  ;;  %v2576_v25 = vld [vmem:[#allocation4 + $0x2ac] ss:$16 sps:$4 sm:$0xff]   ;;  %v2571_v26 = vld [vmem:[#allocation4 + $0x2a0] ss:$16 sps:$4 sm:$0xff]  }
 0x184   :  { %1547 = vmatpush1.bf16.msra.mxu0 %v2535_v27  ;;  %1633 = vmatpush1.bf16.msra.mxu1 %v2538_v28  ;;  %v2574_v27 = vld [vmem:[#allocation4 + $0x2a8] ss:$16 sps:$4 sm:$0xff]   ;;  %v2579_v28 = vld [vmem:[#allocation4 + $0x2c4] ss:$16 sps:$4 sm:$0xff]  }
 0x185   :  { %1559 = vmatprep.subr.bf16.mxu0 %v2543_v29  ;;  %1645 = vmatprep.subr.bf16.mxu1 %v2546_v30  ;;  %v2582_v29 = vld [vmem:[#allocation4 + $0x2cc] ss:$16 sps:$4 sm:$0xff]   ;;  %v2577_v30 = vld [vmem:[#allocation4 + $0x2c0] ss:$16 sps:$4 sm:$0xff]  }
 0x21a   :  { %v662_v42 = vpop.f32.mrb[4].mxu0  ;;  %v705_v43 = vpop.f32.mrb[4].mxu1 }
 0x21b   :  { %v663_v44 = vadd.f32 %v662_v42, %v451_v38  ;;  %v706_v45 = vadd.f32 %v705_v43, %v459_v39  ;;  %v664_v46 = vpop.f32.mrb[5].mxu0  ;;  %v707_v47 = vpop.f32.mrb[5].mxu1  ;;  %v2594_v42 = vld [vmem:[#allocation4 + $0x30c] ss:$16 sps:$4 sm:$0xff]   ;;  %v2589_v43 = vld [vmem:[#allocation4 + $0x300] ss:$16 sps:$4 sm:$0xff]  }
 0x21c   :  { %v665_v48 = vadd.f32 %v664_v46, %v455_v40  ;;  %v708_v49 = vadd.f32 %v707_v47, %v463_v41  ;;  %v666_v50 = vpop.f32.mrb[6].mxu0  ;;  %v709_v51 = vpop.f32.mrb[6].mxu1  ;;  %v2600_v46 = vld [vmem:[#allocation4 + $0x32c] ss:$16 sps:$4 sm:$0xff]   ;;  %v2595_v47 = vld [vmem:[#allocation4 + $0x320] ss:$16 sps:$4 sm:$0xff]  }
 0x21d   :  { %v667_v52 = vadd.f32 %v666_v50, %v451_v38  ;;  %v710_v53 = vadd.f32 %v709_v51, %v459_v39  ;;  %v668_v54 = vpop.f32.mrb[7].mxu0  ;;  %v711_v55 = vpop.f32.mrb[7].mxu1  ;;  %v714_v58 = vmax.f32 %v663_v44, 0.0  ;;  %v716_v59 = vmax.f32 %v706_v45, 0.0  ;;  %v2588_v38 = vld [vmem:[#allocation4 + $0x2ec] ss:$16 sps:$4 sm:$0xff]  }
 0x21e   :  { %v669_v56 = vadd.f32 %v668_v54, %v455_v40  ;;  %v712_v57 = vadd.f32 %v711_v55, %v463_v41  ;;  %v715_v62 = vmax.f32 %v665_v48, 0.0  ;;  %v717_v63 = vmax.f32 %v708_v49, 0.0  ;;  %v2583_v39 = vld [vmem:[#allocation4 + $0x2e0] ss:$16 sps:$4 sm:$0xff]   ;;  %v2586_v40 = vld [vmem:[#allocation4 + $0x2e8] ss:$16 sps:$4 sm:$0xff]  }
 0x21f   :  { %v718_v60 = vmax.f32 %v667_v52, 0.0  ;;  %v720_v61 = vmax.f32 %v710_v53, 0.0  ;;  %v2591_v41 = vld [vmem:[#allocation4 + $0x304] ss:$16 sps:$4 sm:$0xff]   ;;  %v2592_v44 = vld [vmem:[#allocation4 + $0x308] ss:$16 sps:$4 sm:$0xff]  }
 0x220   :  { %v719_v0 = vmax.f32 %v669_v56, 0.0  ;;  %v721_v1 = vmax.f32 %v712_v57, 0.0  ;;  %v2597_v45 = vld [vmem:[#allocation4 + $0x324] ss:$16 sps:$4 sm:$0xff]   ;;  %v2598_v48 = vld [vmem:[#allocation4 + $0x328] ss:$16 sps:$4 sm:$0xff]  }
 0x221   :  { %v722_v2 = vpack.c.bf16 %v718_v60, %v714_v58  ;;  %v2988_v3 = vpack.c.bf16 %v720_v61, %v716_v59  ;;  %v2603_v49 = vld [vmem:[#allocation4 + $0x344] ss:$16 sps:$4 sm:$0xff]   ;;  %v2606_v50 = vld [vmem:[#allocation4 + $0x34c] ss:$16 sps:$4 sm:$0xff]   ;;  %v2601_v51 = vld [vmem:[#allocation4 + $0x340] ss:$16 sps:$4 sm:$0xff]  }
 0x222   :  { %v723_v4 = vpack.c.bf16 %v719_v0, %v715_v62  ;;  %v725_v5 = vpack.c.bf16 %v721_v1, %v717_v63  ;;  %v2604_v52 = vld [vmem:[#allocation4 + $0x348] ss:$16 sps:$4 sm:$0xff]   ;;  %v2609_v53 = vld [vmem:[#allocation4 + $0x364] ss:$16 sps:$4 sm:$0xff]   ;;  %v2612_v54 = vld [vmem:[#allocation4 + $0x36c] ss:$16 sps:$4 sm:$0xff]  }
 0x223   :  { %v2607_v55 = vld [vmem:[#allocation4 + $0x360] ss:$16 sps:$4 sm:$0xff]   ;;  %v2610_v56 = vld [vmem:[#allocation4 + $0x368] ss:$16 sps:$4 sm:$0xff]   ;;  %v2615_v57 = vld [vmem:[#allocation4 + $0x384] ss:$16 sps:$4 sm:$0xff]  }
 0x224   :  { %1548 = vmatprep.mubr.bf16.mxu0 %v723_v4  ;;  %1634 = vmatprep.mubr.bf16.mxu1 %v723_v4  ;;  %v2618_v58 = vld [vmem:[#allocation4 + $0x38c] ss:$16 sps:$4 sm:$0xff]   ;;  %v2613_v59 = vld [vmem:[#allocation4 + $0x380] ss:$16 sps:$4 sm:$0xff]   ;;  %v2616_v60 = vld [vmem:[#allocation4 + $0x388] ss:$16 sps:$4 sm:$0xff]  }
 0x225   :  { %1549 = vmatmul.mubr.bf16.vlgmr.msra.gmra.mrb[8].mxu0 %v722_v2  ;;  %1635 = vmatmul.mubr.bf16.vlgmr.msra.gmra.mrb[8].mxu1 %v722_v2  ;;  %v2621_v61 = vld [vmem:[#allocation4 + $0x3a4] ss:$16 sps:$4 sm:$0xff]   ;;  %v2624_v62 = vld [vmem:[#allocation4 + $0x3ac] ss:$16 sps:$4 sm:$0xff]   ;;  %v2619_v63 = vld [vmem:[#allocation4 + $0x3a0] ss:$16 sps:$4 sm:$0xff]  }
 0x226   :  { %1560 = vmatpush1.bf16.msra.mxu0 %v2541_v6  ;;  %1646 = vmatpush1.bf16.msra.mxu1 %v2544_v7  ;;  %v2622_v0 = vld [vmem:[#allocation4 + $0x3a8] ss:$16 sps:$4 sm:$0xff]   ;;  %v2627_v1 = vld [vmem:[#allocation4 + $0x3c4] ss:$16 sps:$4 sm:$0xff]   ;;  %v2630_v2 = vld [vmem:[#allocation4 + $0x3cc] ss:$16 sps:$4 sm:$0xff]  }
 0x227   :  { %1591 = vmatprep.mubr.bf16.mxu0 %v725_v5  ;;  %1677 = vmatprep.mubr.bf16.mxu1 %v725_v5  ;;  %v2625_v4 = vld [vmem:[#allocation4 + $0x3c0] ss:$16 sps:$4 sm:$0xff]   ;;  %v2628_v5 = vld [vmem:[#allocation4 + $0x3c8] ss:$16 sps:$4 sm:$0xff]   ;;  %v2633_v6 = vld [vmem:[#allocation4 + $0x3e4] ss:$16 sps:$4 sm:$0xff]  }
 0x228   :  { %1561 = vmatprep.subr.bf16.mxu0 %v2549_v8  ;;  %1647 = vmatprep.subr.bf16.mxu1 %v2552_v9  ;;  %v2636_v7 = vld [vmem:[#allocation4 + $0x3ec] ss:$16 sps:$4 sm:$0xff]   ;;  %v2631_v8 = vld [vmem:[#allocation4 + $0x3e0] ss:$16 sps:$4 sm:$0xff]   ;;  %v2634_v9 = vld [vmem:[#allocation4 + $0x3e8] ss:$16 sps:$4 sm:$0xff]  }
 0x22a   :  { %1562 = vmatpush1.bf16.msra.mxu0 %v2547_v10  ;;  %1648 = vmatpush1.bf16.msra.mxu1 %v2550_v11  ;;  %v2637_v10 = vld [vmem:[#allocation6 + $0x40] sm:$0xff]  }
 0x22b   :  { %1563 = vmatprep.subr.bf16.mxu0 %v2555_v12  ;;  %1649 = vmatprep.subr.bf16.mxu1 %v2558_v13  ;;  %v2638_v11 = vld [vmem:[#allocation6 + $0xc0] sm:$0xff]  }
 0x22c   :  { %v2639_v12 = vld [vmem:[#allocation6] sm:$0xff]  }
 0x22d   :  { %v2640_v13 = vld [vmem:[#allocation6 + $0x80] sm:$0xff]  }
 0x22e   :  { %1564 = vmatpush1.bf16.msra.mxu0 %v2553_v14  ;;  %1650 = vmatpush1.bf16.msra.mxu1 %v2556_v15  ;;  %v2641_v14 = vld [vmem:[#allocation6 + $0x48] sm:$0xff]  }
 0x22f   :  { %1565 = vmatprep.subr.bf16.mxu0 %v2561_v16  ;;  %1651 = vmatprep.subr.bf16.mxu1 %v2564_v17  ;;  %v2642_v15 = vld [vmem:[#allocation6 + $0xc8] sm:$0xff]  }
 0x230   :  { %v2643_v16 = vld [vmem:[#allocation6 + $0x8] sm:$0xff]  }
 0x231   :  { %v2644_v17 = vld [vmem:[#allocation6 + $0x88] sm:$0xff]  }
 0x232   :  { %1566 = vmatpush1.bf16.msra.mxu0 %v2559_v18  ;;  %1652 = vmatpush1.bf16.msra.mxu1 %v2562_v19  ;;  %v2645_v18 = vld [vmem:[#allocation6 + $0x50] sm:$0xff]  }
 0x233   :  { %1567 = vmatprep.subr.bf16.mxu0 %v2567_v20  ;;  %1653 = vmatprep.subr.bf16.mxu1 %v2570_v21  ;;  %v2646_v19 = vld [vmem:[#allocation6 + $0xd0] sm:$0xff]  }
 0x234   :  { %v2647_v20 = vld [vmem:[#allocation6 + $0x10] sm:$0xff]  }
 0x235   :  { %v2648_v21 = vld [vmem:[#allocation6 + $0x90] sm:$0xff]  }
 0x236   :  { %1568 = vmatpush1.bf16.msra.mxu0 %v2565_v22  ;;  %1654 = vmatpush1.bf16.msra.mxu1 %v2568_v23  ;;  %v2649_v22 = vld [vmem:[#allocation6 + $0x58] sm:$0xff]  }
 0x237   :  { %1569 = vmatprep.subr.bf16.mxu0 %v2573_v24  ;;  %1655 = vmatprep.subr.bf16.mxu1 %v2576_v25  ;;  %v2650_v23 = vld [vmem:[#allocation6 + $0xd8] sm:$0xff]   ;;  %v2653_v25 = vld [vmem:[#allocation6 + $0x60] sm:$0xff]  }
 0x238   :  { %v2651_v24 = vld [vmem:[#allocation6 + $0x18] sm:$0xff]  }
 0x23a   :  { %1570 = vmatpush1.bf16.msra.mxu0 %v2571_v26  ;;  %1656 = vmatpush1.bf16.msra.mxu1 %v2574_v27  ;;  %v2654_v26 = vld [vmem:[#allocation6 + $0xe0] sm:$0xff]  }
 0x23b   :  { %1571 = vmatprep.subr.bf16.mxu0 %v2579_v28  ;;  %1657 = vmatprep.subr.bf16.mxu1 %v2582_v29  ;;  %v2655_v27 = vld [vmem:[#allocation6 + $0x20] sm:$0xff]   ;;  %v2657_v29 = vld [vmem:[#allocation6 + $0x68] sm:$0xff]  }
 0x23c   :  { %v2656_v28 = vld [vmem:[#allocation6 + $0xa0] sm:$0xff]  }
 0x23e   :  { %1572 = vmatpush1.bf16.msra.mxu0 %v2577_v30  ;;  %1658 = vmatpush1.bf16.msra.mxu1 %v2580_v31  ;;  %v2658_v30 = vld [vmem:[#allocation6 + $0xe8] sm:$0xff]  }
 0x23f   :  { %1573 = vmatprep.subr.bf16.mxu0 %v2585_v35  ;;  %1659 = vmatprep.subr.bf16.mxu1 %v2588_v38  ;;  %v2659_v31 = vld [vmem:[#allocation6 + $0x28] sm:$0xff]   ;;  %v2661_v38 = vld [vmem:[#allocation6 + $0x70] sm:$0xff]  }
 0x240   :  { %v2660_v35 = vld [vmem:[#allocation6 + $0xa8] sm:$0xff]  }
 0x242   :  { %1574 = vmatpush1.bf16.msra.mxu0 %v2583_v39  ;;  %1660 = vmatpush1.bf16.msra.mxu1 %v2586_v40  ;;  %v2662_v39 = vld [vmem:[#allocation6 + $0xf0] sm:$0xff]  }
 0x243   :  { %1575 = vmatprep.subr.bf16.mxu0 %v2591_v41  ;;  %1661 = vmatprep.subr.bf16.mxu1 %v2594_v42  ;;  %v2663_v40 = vld [vmem:[#allocation6 + $0x30] sm:$0xff]   ;;  %v2665_v42 = vld [vmem:[#allocation6 + $0x78] sm:$0xff]  }
 0x244   :  { %v2664_v41 = vld [vmem:[#allocation6 + $0xb0] sm:$0xff]  }
 0x246   :  { %1576 = vmatpush1.bf16.msra.mxu0 %v2589_v43  ;;  %1662 = vmatpush1.bf16.msra.mxu1 %v2592_v44  ;;  %v2666_v43 = vld [vmem:[#allocation6 + $0xf8] sm:$0xff]  }
 0x247   :  { %1577 = vmatprep.subr.bf16.mxu0 %v2597_v45  ;;  %1663 = vmatprep.subr.bf16.mxu1 %v2600_v46  ;;  %v2667_v44 = vld [vmem:[#allocation6 + $0x38] sm:$0xff]  }
 0x248   :  { %v2668_v45 = vld [vmem:[#allocation6 + $0xb8] sm:$0xff]  }
 0x249   :  { %v854_v46 = vld [vmem:[%s3018_s6] sm:$0xf] }
 0x24a   :  { %1578 = vmatpush1.bf16.msra.mxu0 %v2595_v47  ;;  %1664 = vmatpush1.bf16.msra.mxu1 %v2598_v48  ;;  %v859_v47 = vrot.slane %v854_v46, %v450_v33  ;;  %v867_v48 = vrot.slane %v854_v46, %v458_v34 }
 0x24b   :  { %1579 = vmatprep.subr.bf16.mxu0 %v2603_v49  ;;  %1665 = vmatprep.subr.bf16.mxu1 %v2606_v50  ;;  %v863_v49 = vrot.slane %v854_v46, %v454_v36  ;;  %v871_v50 = vrot.slane %v854_v46, %v462_v37 }
 0x24e   :  { %1580 = vmatpush1.bf16.msra.mxu0 %v2601_v51  ;;  %1666 = vmatpush1.bf16.msra.mxu1 %v2604_v52 }
 0x24f   :  { %1581 = vmatprep.subr.bf16.mxu0 %v2609_v53  ;;  %1667 = vmatprep.subr.bf16.mxu1 %v2612_v54 }
 0x252   :  { %1582 = vmatpush1.bf16.msra.mxu0 %v2607_v55  ;;  %1668 = vmatpush1.bf16.msra.mxu1 %v2610_v56 }
 0x253   :  { %1583 = vmatprep.subr.bf16.mxu0 %v2615_v57  ;;  %1669 = vmatprep.subr.bf16.mxu1 %v2618_v58 }
 0x256   :  { %1584 = vmatpush1.bf16.msra.mxu0 %v2613_v59  ;;  %1670 = vmatpush1.bf16.msra.mxu1 %v2616_v60 }
 0x257   :  { %1585 = vmatprep.subr.bf16.mxu0 %v2621_v61  ;;  %1671 = vmatprep.subr.bf16.mxu1 %v2624_v62 }
 0x25a   :  { %1586 = vmatpush1.bf16.msra.mxu0 %v2619_v63  ;;  %1672 = vmatpush1.bf16.msra.mxu1 %v2622_v0 }
 0x25b   :  { %1587 = vmatprep.subr.bf16.mxu0 %v2627_v1  ;;  %1673 = vmatprep.subr.bf16.mxu1 %v2630_v2 }
 0x25e   :  { %1588 = vmatpush1.bf16.msra.mxu0 %v2625_v4  ;;  %1674 = vmatpush1.bf16.msra.mxu1 %v2628_v5 }
 0x25f   :  { %1589 = vmatprep.subr.bf16.mxu0 %v2633_v6  ;;  %1675 = vmatprep.subr.bf16.mxu1 %v2636_v7 }
 0x262   :  { %1590 = vmatpush1.bf16.msra.mxu0 %v2631_v8  ;;  %1676 = vmatpush1.bf16.msra.mxu1 %v2634_v9 }
 0x263   :  { %2300 = vmatprep.subr.bf16.mxu0 %v2637_v10  ;;  %2322 = vmatprep.subr.bf16.mxu1 %v2638_v11 }
 0x265   :  { %1592 = vmatmul.mubr.bf16.vlgmr.msra.gmra.mrb[8].mxu0 %v2988_v3  ;;  %1678 = vmatmul.mubr.bf16.vlgmr.msra.gmra.mrb[8].mxu1 %v2988_v3  ;;  %v2652_v3 = vld [vmem:[#allocation6 + $0x98] sm:$0xff]  }
 0x266   :  { %2301 = vmatpush3.bf16.msra.mxu0 %v2639_v12  ;;  %2323 = vmatpush3.bf16.msra.mxu1 %v2640_v13  ;;  %v2245_v13 = vld [vmem:[%s3020_s8] ss:$0 sm:$0xff] }
 0x267   :  { %2302 = vmatprep.subr.bf16.mxu0 %v2641_v14  ;;  %2324 = vmatprep.subr.bf16.mxu1 %v2642_v15 }
 0x26a   :  { %2303 = vmatpush3.bf16.msra.mxu0 %v2643_v16  ;;  %2325 = vmatpush3.bf16.msra.mxu1 %v2644_v17 }
 0x26b   :  { %2304 = vmatprep.subr.bf16.mxu0 %v2645_v18  ;;  %2326 = vmatprep.subr.bf16.mxu1 %v2646_v19 }
 0x26e   :  { %2305 = vmatpush3.bf16.msra.mxu0 %v2647_v20  ;;  %2327 = vmatpush3.bf16.msra.mxu1 %v2648_v21 }
 0x26f   :  { %2306 = vmatprep.subr.bf16.mxu0 %v2649_v22  ;;  %2328 = vmatprep.subr.bf16.mxu1 %v2650_v23 }
 0x272   :  { %2307 = vmatpush3.bf16.msra.mxu0 %v2651_v24  ;;  %2329 = vmatpush3.bf16.msra.mxu1 %v2652_v3 }
 0x273   :  { %2308 = vmatprep.subr.bf16.mxu0 %v2653_v25  ;;  %2330 = vmatprep.subr.bf16.mxu1 %v2654_v26 }
 0x276   :  { %2309 = vmatpush3.bf16.msra.mxu0 %v2655_v27  ;;  %2331 = vmatpush3.bf16.msra.mxu1 %v2656_v28 }
 0x277   :  { %2310 = vmatprep.subr.bf16.mxu0 %v2657_v29  ;;  %2332 = vmatprep.subr.bf16.mxu1 %v2658_v30 }
 0x27a   :  { %2311 = vmatpush3.bf16.msra.mxu0 %v2659_v31  ;;  %2333 = vmatpush3.bf16.msra.mxu1 %v2660_v35 }
 0x27b   :  { %2312 = vmatprep.subr.bf16.mxu0 %v2661_v38  ;;  %2334 = vmatprep.subr.bf16.mxu1 %v2662_v39 }
 0x27e   :  { %2313 = vmatpush3.bf16.msra.mxu0 %v2663_v40  ;;  %2335 = vmatpush3.bf16.msra.mxu1 %v2664_v41 }
 0x27f   :  { %2314 = vmatprep.subr.bf16.mxu0 %v2665_v42  ;;  %2336 = vmatprep.subr.bf16.mxu1 %v2666_v43 }
 0x282   :  { %2315 = vmatpush3.bf16.msra.mxu0 %v2667_v44  ;;  %2337 = vmatpush3.bf16.msra.mxu1 %v2668_v45 }
 0x338   :  { %v1593_v51 = vpop.f32.mrb[8].mxu0  ;;  %v1679_v52 = vpop.f32.mrb[8].mxu1 }
 0x339   :  { %v2344_v53 = vadd.f32 %v1593_v51, %v859_v47  ;;  %v2348_v54 = vadd.f32 %v1679_v52, %v867_v48  ;;  %v1595_v55 = vpop.f32.mrb[9].mxu0  ;;  %v1681_v56 = vpop.f32.mrb[9].mxu1 }
 0x33a   :  { %v2345_v57 = vadd.f32 %v1595_v55, %v863_v49  ;;  %v2349_v58 = vadd.f32 %v1681_v56, %v871_v50  ;;  %v1597_v59 = vpop.f32.mrb[10].mxu0  ;;  %v1683_v60 = vpop.f32.mrb[10].mxu1 }
 0x33b   :  { %v2346_v33 = vadd.f32 %v1597_v59, %v859_v47  ;;  %v2350_v61 = vadd.f32 %v1683_v60, %v867_v48  ;;  %v1599_v62 = vpop.f32.mrb[11].mxu0  ;;  %v1685_v34 = vpop.f32.mrb[11].mxu1  ;;  %v1688_v36 = vmax.f32 %v2344_v53, 0.0  ;;  %v1690_v1 = vmax.f32 %v2348_v54, 0.0 }
 0x33c   :  { %v2347_v63 = vadd.f32 %v1599_v62, %v863_v49  ;;  %v2351_v0 = vadd.f32 %v1685_v34, %v871_v50  ;;  %v1689_v2 = vmax.f32 %v2345_v57, 0.0  ;;  %v1691_v4 = vmax.f32 %v2349_v58, 0.0 }
 0x33d   :  { %v1692_v32 = vmax.f32 %v2346_v33, 0.0  ;;  %v1694_v37 = vmax.f32 %v2350_v61, 0.0 }
 0x33e   :  { %v1693_v5 = vmax.f32 %v2347_v63, 0.0  ;;  %v1695_v6 = vmax.f32 %v2351_v0, 0.0 }
 0x33f   :  { %v1696_v7 = vpack.c.bf16 %v1692_v32, %v1688_v36  ;;  %v1698_v8 = vpack.c.bf16 %v1694_v37, %v1690_v1 }
 0x340   :  { %v1697_v9 = vpack.c.bf16 %v1693_v5, %v1689_v2  ;;  %v1699_v10 = vpack.c.bf16 %v1695_v6, %v1691_v4 }
 0x342   :  { %1995 = vmatprep.mubr.bf16.mxu0 %v1697_v9  ;;  %2036 = vmatprep.mubr.bf16.mxu1 %v1699_v10 }
 0x343   :  { %1996 = vmatmul.mubr.bf16.vlgmr.msra.gmra.mrb[12].mxu0 %v1696_v7  ;;  %2037 = vmatmul.mubr.bf16.vlgmr.msra.gmra.mrb[12].mxu1 %v1698_v8 }
 0x416   :  { %v2316_v11 = vpop.f32.mrb[12].mxu0  ;;  %v2338_v12 = vpop.f32.mrb[12].mxu1 }
 0x417   :  { %v2317_v14 = vpop.f32.mrb[13].mxu0  ;;  %v2339_v15 = vpop.f32.mrb[13].mxu1 }
 0x418   :  { %v2318_v16 = vadd.f32 %v2317_v14, %v2316_v11  ;;  %v2340_v17 = vadd.f32 %v2339_v15, %v2338_v12  ;;  %v2319_v18 = vpop.f32.mrb[14].mxu0  ;;  %v2341_v19 = vpop.f32.mrb[14].mxu1 }
 0x419   :  { %v2320_v20 = vpop.f32.mrb[15].mxu0  ;;  %v2342_v21 = vpop.f32.mrb[15].mxu1 }
 0x41a   :  { %v1998_v22 = vadd.f32 %v2318_v16, %v2245_v13  ;;  %v2321_v23 = vadd.f32 %v2320_v20, %v2319_v18  ;;  %v2343_v24 = vadd.f32 %v2342_v21, %v2341_v19 }
 0x41c   :  { %v2039_v3 = vadd.f32 %v2340_v17, %v1998_v22  ;;  %v2001_v25 = vadd.f32 %v2321_v23, %v2245_v13 }
 0x41e   :  { %2046 = vst.msk [vmem:[%s3021_s9] sm:$0xff] %vm2045_vm2, %v2039_v3  ;;  %v2042_v26 = vadd.f32 %v2343_v24, %v2001_v25 }
 0x420   :  { %2047 = vst.msk [vmem:[%s3021_s9 + $0x8] sm:$0xff] %vm2045_vm2, %v2042_v26 }
 0x421   :  { %2052 = vsyncpa [#allocation3], 1 }
 0x422   :  { %2053 = vsyncpa [#allocation5], 1 }

</bundles_post_ra>
